<compile_context>
chip_gen: v7x
topology: tpu7x:2x2x1
jax: 0.10.0
libtpu: 0.0.40
codegen_flags: <defaults>
</compile_context>

<pallas_src>
import jax
import jax.numpy as jnp
from jax import lax
from jax.experimental import pallas as pl
from jax.experimental.pallas import tpu as pltpu

EPS = 1e-8


def _round_up(x, m):
    return ((x + m - 1) // m) * m


def _make_kernel(n_true, c, n_tiles):
    inv_n = 1.0 / n_true
    inv_nm1 = 1.0 / (n_true - 1)
    inv_offdiag = 1.0 / (c * (c - 1))

    def kernel(x_ref, out_ref, g_ref):
        i = pl.program_id(0)

        @pl.when(i == 0)
        def _init():
            g_ref[...] = jnp.zeros_like(g_ref)

        # Steady state: one MXU op per tile.  x is (TN, C+1) with a constant ones
        # column, so the augmented Gram carries the plain Gram in [:C,:C] and the
        # column sums in its last row/column.  Contract over the row (batch) dim —
        # no explicit transpose materialized.
        x = x_ref[...]
        g_ref[...] += lax.dot_general(
            x, x,
            dimension_numbers=(((0,), (0,)), ((), ())),
            preferred_element_type=jnp.float32,
        )

        @pl.when(i == n_tiles - 1)
        def _finalize():
            g_aug = g_ref[...]                         # (C+1, C+1), f32
            g = g_aug[:c, :c]                          # (C, C)   G = X^T X
            s_row = g_aug[c:c + 1, :c]                 # (1, C)   column sums
            s_col = g_aug[:c, c:c + 1]                 # (C, 1)

            mean_row = s_row * jnp.float32(inv_n)      # (1, C)
            mean_col = s_col * jnp.float32(inv_n)      # (C, 1)

            # Centered Gram via VPU broadcast outer product (no K=1 MXU pushes).
            gc = g - s_col * mean_row                  # (C, C)

            # diag(G) via one-time iota-mask reduce; both orientations so the
            # scaling outer product needs no transposes.
            rows = lax.broadcasted_iota(jnp.int32, (c, c), 0)
            cols = lax.broadcasted_iota(jnp.int32, (c, c), 1)
            eye = rows == cols
            g_diag_masked = jnp.where(eye, g, 0.0)
            diag_row = jnp.sum(g_diag_masked, axis=0, keepdims=True)   # (1, C)
            diag_col = jnp.sum(g_diag_masked, axis=1, keepdims=True)   # (C, 1)

            # Per-feature unbiased variance and inverse std (EUP rsqrt).
            var_row = (diag_row - s_row * mean_row) * jnp.float32(inv_nm1)
            var_col = (diag_col - s_col * mean_col) * jnp.float32(inv_nm1)
            inv_std_row = lax.rsqrt(jnp.float32(EPS) + var_row)        # (1, C)
            inv_std_col = lax.rsqrt(jnp.float32(EPS) + var_col)        # (C, 1)

            # Correlation matrix and exact off-diagonal mean-of-squares.
            corr = gc * inv_std_col * inv_std_row      # (C, C)
            off = jnp.where(eye, 0.0, corr)
            loss = jnp.sum(off * off) * jnp.float32(inv_offdiag) * jnp.float32(inv_n)
            out_ref[0] = loss

    return kernel


def feddecorr_loss(x, *, tile_n=1024):
    """x: (N, C) array. Returns scalar float32 loss."""
    N, C = x.shape
    if N == 1:
        return jnp.float32(0.0)

    itemsize = jnp.dtype(x.dtype).itemsize
    granule = max(8, 32 // itemsize)                 # f32: 8, bf16: 16, int8/fp8: 32
    tn = min(_round_up(tile_n, granule), _round_up(N, granule))
    n_pad = _round_up(N, tn)
    n_tiles = n_pad // tn
    c_aug = C + 1

    # Ones column folded into the Gram so column sums ride the MXU; zero-padded
    # ragged rows (all-zero, including the ones column) contribute nothing to G_aug.
    x_aug = jnp.concatenate([x, jnp.ones((N, 1), dtype=x.dtype)], axis=1)
    if n_pad != N:
        x_aug = jnp.pad(x_aug, ((0, n_pad - N), (0, 0)))

    kernel = _make_kernel(N, C, n_tiles)

    # Explicit VMEM budget: f32 (C+1,C+1) accumulator + double-buffered input tile
    # (both padded to the (8, 128) layout granule), plus headroom.
    lane_pad = _round_up(c_aug, 128)
    acc_bytes = 4 * _round_up(c_aug, 8) * lane_pad
    tile_bytes = itemsize * tn * lane_pad
    vmem_limit = int(min(max(acc_bytes + 2 * tile_bytes + (2 << 20), 32 << 20), 100 << 20))

    out = pl.pallas_call(
        kernel,
        out_shape=jax.ShapeDtypeStruct((1,), jnp.float32),
        grid_spec=pltpu.PrefetchScalarGridSpec(
            num_scalar_prefetch=0,
            grid=(n_tiles,),
            in_specs=[pl.BlockSpec((tn, c_aug), lambda i: (i, 0))],
            out_specs=pl.BlockSpec(memory_space=pltpu.SMEM),
            scratch_shapes=[
                pltpu.VMEM((c_aug, c_aug), jnp.float32),   # augmented Gram accumulator
            ],
        ),
        compiler_params=pltpu.CompilerParams(
            dimension_semantics=("arbitrary",),            # N axis is a reduction
            vmem_limit_bytes=vmem_limit,
        ),
        cost_estimate=pl.CostEstimate(
            flops=int(2 * n_pad * c_aug * c_aug + 8 * C * C),
            transcendentals=int(2 * C),
            bytes_accessed=int(n_pad * c_aug * itemsize + 4),
        ),
    )(x_aug)
    return out[0]


def _reference(x):
    # Pure-JAX reference matching the PyTorch module (explicit centering).
    N, C = x.shape
    if N == 1:
        return jnp.float32(0.0)
    x = x.astype(jnp.float32)
    x = x - jnp.mean(x, axis=0, keepdims=True)
    x = x / jnp.sqrt(EPS + jnp.var(x, axis=0, ddof=1, keepdims=True))
    corr = x.T @ x
    off = corr - jnp.diag(jnp.diag(corr))
    loss = jnp.sum(off ** 2) / (C * (C - 1))
    return loss / N


if __name__ == "__main__":
    key = jax.random.PRNGKey(0)
    k1, k2, k3 = jax.random.split(key, 3)

    # Case 1: single tile (N=8, C=32), f32.
    x1 = jax.random.normal(k1, (8, 32), dtype=jnp.float32)
    out1 = feddecorr_loss(x1)
    jax.block_until_ready(out1)
    ref1 = _reference(x1)
    assert jnp.allclose(out1, ref1, rtol=1e-4, atol=1e-5), (out1, ref1)

    # Case 2: multi-tile streaming accumulation + ragged-N zero padding
    # (N=40, tile_n=16 -> 3 tiles, last tile half-padded), f32.
    x2 = jax.random.normal(k2, (40, 32), dtype=jnp.float32)
    out2 = feddecorr_loss(x2, tile_n=16)
    jax.block_until_ready(out2)
    ref2 = _reference(x2)
    assert jnp.allclose(out2, ref2, rtol=1e-4, atol=1e-5), (out2, ref2)

    # Case 3: bf16 input (exercises the 16-row sublane granule path); compare
    # against the f32 reference evaluated on the same bf16-rounded values.
    x3 = jax.random.normal(k3, (48, 32), dtype=jnp.float32).astype(jnp.bfloat16)
    out3 = feddecorr_loss(x3, tile_n=16)
    jax.block_until_ready(out3)
    ref3 = _reference(x3.astype(jnp.float32))
    assert jnp.allclose(out3, ref3, rtol=2e-2, atol=1e-3), (out3, ref3)

    print("KERNEL_OK")
</pallas_src>

<mosaic_0001>
module attributes {stable_mosaic.version = 11 : i64} {
  func.func @kernel(%arg0: i32, %arg1: memref<8x33xf32, #tpu.memory_space<vmem>>, %arg2: memref<1xf32, #tpu.memory_space<smem>>, %arg3: memref<33x33xf32, #tpu.memory_space<vmem>>) attributes {dimension_semantics = [#tpu.dimension_semantics<arbitrary>], iteration_bounds = array<i64: 1>, scalar_prefetch = 0 : i64, scratch_operands = 1 : i64, tpu.core_type = #tpu.core_type<tc>, window_params = [{transform_indices = @transform_0, window_bounds = array<i64: 8, 33>}, {transform_indices = @transform_1, window_bounds = array<i64: 1>}]} {
    %c0_i32 = arith.constant 0 : i32
    %0 = arith.cmpi eq, %arg0, %c0_i32 : i32
    %1 = arith.extui %0 : i1 to i32
    %c0_i32_0 = arith.constant 0 : i32
    %2 = arith.cmpi ne, %1, %c0_i32_0 : i32
    scf.if %2 {
      %cst_8 = arith.constant 0.000000e+00 : f32
      %11 = vector.broadcast %cst_8 : f32 to vector<33x33xf32>
      %c0_9 = arith.constant 0 : index
      %c0_10 = arith.constant 0 : index
      %12 = vector.load %arg3[%c0_9, %c0_10] : memref<33x33xf32, #tpu.memory_space<vmem>>, vector<33x33xf32>
      tpu.vector_store %arg3[%c0_9, %c0_10], %11 {strides = array<i32>} : memref<33x33xf32, #tpu.memory_space<vmem>>, vector<33x33xf32>,
    } else {
    }
    %c0 = arith.constant 0 : index
    %c0_1 = arith.constant 0 : index
    %3 = vector.load %arg1[%c0, %c0_1] : memref<8x33xf32, #tpu.memory_space<vmem>>, vector<8x33xf32>
    %c0_2 = arith.constant 0 : index
    %c0_3 = arith.constant 0 : index
    %4 = vector.load %arg3[%c0_2, %c0_3] : memref<33x33xf32, #tpu.memory_space<vmem>>, vector<33x33xf32>
    %cst = arith.constant dense<0.000000e+00> : vector<33x33xf32>
    %5 = tpu.matmul %3, %3, %cst {dimension_numbers = #tpu.dot_dimension_numbers<[0], [0], [1], [1], [0, 1, 1, 1], [], []>} : vector<8x33xf32>, vector<8x33xf32>, vector<33x33xf32> -> vector<33x33xf32>
    %6 = arith.addf %4, %5 : vector<33x33xf32>
    %c0_4 = arith.constant 0 : index
    %c0_5 = arith.constant 0 : index
    %7 = vector.load %arg3[%c0_4, %c0_5] : memref<33x33xf32, #tpu.memory_space<vmem>>, vector<33x33xf32>
    tpu.vector_store %arg3[%c0_4, %c0_5], %6 {strides = array<i32>} : memref<33x33xf32, #tpu.memory_space<vmem>>, vector<33x33xf32>,
    %c0_i32_6 = arith.constant 0 : i32
    %8 = arith.cmpi eq, %arg0, %c0_i32_6 : i32
    %9 = arith.extui %8 : i1 to i32
    %c0_i32_7 = arith.constant 0 : i32
    %10 = arith.cmpi ne, %9, %c0_i32_7 : i32
    scf.if %10 {
      %c0_8 = arith.constant 0 : index
      %c0_9 = arith.constant 0 : index
      %11 = vector.load %arg3[%c0_8, %c0_9] : memref<33x33xf32, #tpu.memory_space<vmem>>, vector<33x33xf32>
      %12 = vector.extract_strided_slice %11 {offsets = [0, 0], sizes = [32, 32], strides = [1, 1]} : vector<33x33xf32> to vector<32x32xf32>
      %13 = vector.extract_strided_slice %11 {offsets = [32, 0], sizes = [1, 32], strides = [1, 1]} : vector<33x33xf32> to vector<1x32xf32>
      %14 = vector.extract_strided_slice %11 {offsets = [0, 32], sizes = [32, 1], strides = [1, 1]} : vector<33x33xf32> to vector<32x1xf32>
      %cst_10 = arith.constant 1.250000e-01 : f32
      %15 = vector.broadcast %cst_10 : f32 to vector<1x32xf32>
      %16 = arith.mulf %13, %15 : vector<1x32xf32>
      %cst_11 = arith.constant 1.250000e-01 : f32
      %17 = vector.broadcast %cst_11 : f32 to vector<32x1xf32>
      %18 = arith.mulf %14, %17 : vector<32x1xf32>
      %19 = vector.broadcast %14 : vector<32x1xf32> to vector<32x32xf32>
      %20 = vector.broadcast %16 : vector<1x32xf32> to vector<32x32xf32>
      %21 = arith.mulf %19, %20 : vector<32x32xf32>
      %22 = arith.subf %12, %21 : vector<32x32xf32>
      %23 = tpu.iota {dimensions = array<i32: 0>} : vector<32x32xi32>
      %24 = tpu.iota {dimensions = array<i32: 1>} : vector<32x32xi32>
      %25 = arith.cmpi eq, %23, %24 : vector<32x32xi32>
      %cst_12 = arith.constant 0.000000e+00 : f32
      %26 = vector.broadcast %cst_12 : f32 to vector<32x32xf32>
      %27 = arith.select %25, %12, %26 : vector<32x32xi1>, vector<32x32xf32>
      %cst_13 = arith.constant dense<0.000000e+00> : vector<32xf32>
      %28 = vector.multi_reduction <add>, %27, %cst_13 [0] : vector<32x32xf32> to vector<32xf32>
      %29 = vector.shape_cast %28 : vector<32xf32> to vector<1x32xf32>
      %cst_14 = arith.constant dense<0.000000e+00> : vector<32xf32>
      %30 = vector.multi_reduction <add>, %27, %cst_14 [1] : vector<32x32xf32> to vector<32xf32>
      %31 = vector.shape_cast %30 : vector<32xf32> to vector<32x1xf32>
      %32 = arith.mulf %13, %16 : vector<1x32xf32>
      %33 = arith.subf %29, %32 : vector<1x32xf32>
      %cst_15 = arith.constant 0.142857149 : f32
      %34 = vector.broadcast %cst_15 : f32 to vector<1x32xf32>
      %35 = arith.mulf %33, %34 : vector<1x32xf32>
      %36 = arith.mulf %14, %18 : vector<32x1xf32>
      %37 = arith.subf %31, %36 : vector<32x1xf32>
      %cst_16 = arith.constant 0.142857149 : f32
      %38 = vector.broadcast %cst_16 : f32 to vector<32x1xf32>
      %39 = arith.mulf %37, %38 : vector<32x1xf32>
      %cst_17 = arith.constant 9.99999993E-9 : f32
      %40 = vector.broadcast %cst_17 : f32 to vector<1x32xf32>
      %41 = arith.addf %40, %35 : vector<1x32xf32>
      %42 = math.rsqrt %41 : vector<1x32xf32>
      %cst_18 = arith.constant 9.99999993E-9 : f32
      %43 = vector.broadcast %cst_18 : f32 to vector<32x1xf32>
      %44 = arith.addf %43, %39 : vector<32x1xf32>
      %45 = math.rsqrt %44 : vector<32x1xf32>
      %46 = vector.broadcast %45 : vector<32x1xf32> to vector<32x32xf32>
      %47 = arith.mulf %22, %46 : vector<32x32xf32>
      %48 = vector.broadcast %42 : vector<1x32xf32> to vector<32x32xf32>
      %49 = arith.mulf %47, %48 : vector<32x32xf32>
      %cst_19 = arith.constant 0.000000e+00 : f32
      %50 = vector.broadcast %cst_19 : f32 to vector<32x32xf32>
      %51 = arith.select %25, %50, %49 : vector<32x32xi1>, vector<32x32xf32>
      %52 = arith.mulf %51, %51 : vector<32x32xf32>
      %53 = vector.shape_cast %52 : vector<32x32xf32> to vector<1x32x32xf32>
      %cst_20 = arith.constant dense<0.000000e+00> : vector<1xf32>
      %54 = vector.multi_reduction <add>, %53, %cst_20 [1, 2] : vector<1x32x32xf32> to vector<1xf32>
      %55 = vector.shape_cast %54 : vector<1xf32> to vector<1x1x1xf32>
      %56 = vector.extract %55[0, 0, 0] : f32 from vector<1x1x1xf32>
      %cst_21 = arith.constant 0.00100806449 : f32
      %57 = arith.mulf %56, %cst_21 : f32
      %cst_22 = arith.constant 1.250000e-01 : f32
      %58 = arith.mulf %57, %cst_22 : f32
      %c0_23 = arith.constant 0 : index
      %59 = memref.load %arg2[%c0_23] : memref<1xf32, #tpu.memory_space<smem>>
      memref.store %58, %arg2[%c0_23] : memref<1xf32, #tpu.memory_space<smem>>
    } else {
    }
    return
  }
  func.func @transform_0(%arg0: i32) -> (i32, i32) {
    %c0_i32 = arith.constant 0 : i32
    %c0_i32_0 = arith.constant 0 : i32
    return %arg0, %c0_i32 : i32, i32
  }
  func.func @transform_1(%arg0: i32) -> i32 {
    %c0_i32 = arith.constant 0 : i32
    %c0_i32_0 = arith.constant 0 : i32
    return %c0_i32 : i32
  }
}

</mosaic_0001>

<bundles_post_ra>
// kernel: tpu_custom_call.1
= control target key start
LH: loop header
LB: loop body
LE: loop exit
PB: predicated region body
PF: predicated region fallthrough
CT: control target
= control target key end

     0   :  { %6 = vsyncpa [#allocation4], 0  ;;  %s596_s0 = inlined_call_operand.hbm [shape: f32[8,33], index: 0, kind: input, shape index: {}]   ;;  %s597_s1 = inlined_call_operand.hbm [shape: f32[1], index: 1, kind: output, shape index: {}]  }
   0x1   :  { %7 = vsyncpa [#allocation5], 0  ;;  %s454_s6 = smov [#allocation3]   ;;  %s418_s10 = scalar_lea.hbm %s596_s0, 128 }
   0x2   :  { %s14_s7 = sshll.u32 %s454_s6, 4  ;;  %p419_p0 = scmp.ne.s32.totalorder %s596_s0, %s418_s10  ;;  %s15_s7 = int_to_ptr.vmem [resolvable:$true] %s14_s7 }
   0x3   :  { %p422_p1 = scmp.lt.u32.totalorder %s418_s10, %s596_s0 }
   0x5   :  { %p424_p2 = pnand %p422_p1, %p419_p0 }
   0x7   :  { %427 = shalt.err (!%p424_p2)
}
   0x8   :  { %s428_s15 = scalar_lea.vmem %s15_s7, 128  ;;  %p433_p4 = scmp.lt.s32.totalorder %s15_s7, %s15_s7 }
   0x9   :  { %p429_p3 = scmp.ne.s32.totalorder %s15_s7, %s428_s15  ;;  %p434_p5 = scmp.lt.s32.totalorder %s428_s15, %s428_s15 }
   0xb   :  { %p435_p6 = por %p434_p5, %p433_p4 }
   0xd   :  { %p436_p7 = pnand %p435_p6, %p429_p3 }
   0xf   :  { %439 = shalt.err (!%p436_p7)
}
  0x10   :  { %17 = dma.hbm_to_vmem [thread:$0]  %s596_s0, 128, %s15_s7, [#allocation4]  }
  0x11   :  { %450 = dma.done.wait [#allocation4], 128  }
  0x12   :  { %451 = vsyncadd [#allocation4], 4294967168  ;;  %v455_v0 = vmov 0.0   ;;  %vm456_vm0 = vmmov 0   ;;  %v32_v1 = vld [vmem:[#allocation3] sm:$0xff]  ;;  %vm25_vm1 = vcmask 269312   ;;  %v221_v10 = vlaneseq }
  0x13   :  { %380 = vmatprep.subr.mxu0 %v455_v0  ;;  %382 = vmatprep.mubr.msk.f32.mxu0 %vm456_vm0, %v455_v0  ;;  %26 = vst.msk [vmem:[#allocation2] sm:$0xff] %vm25_vm1, %v455_v0  ;;  %27 = vst.msk [vmem:[#allocation2 + $0x8] sm:$0xff] %vm25_vm1, %v455_v0  ;;  %vm70_vm2 = vcmask 64512   ;;  %vm30_vm3 = vcmask 262144   ;;  %v457_v7 = vmov 32   ;;  %vm248_vm5 = vcmask 261120  }
  0x14   :  { %397 = vmatprep.subr.mxu1 %v455_v0  ;;  %391 = vmatprep.mubr.msk.f32.mxu1 %vm456_vm0, %v455_v0  ;;  %28 = vst.msk [vmem:[#allocation2 + $0x10] sm:$0xff] %vm25_vm1, %v455_v0  ;;  %29 = vst.msk [vmem:[#allocation2 + $0x18] sm:$0xff] %vm25_vm1, %v455_v0  ;;  %v492_v15 = vshrl.u32 %v221_v10, 7  ;;  %v494_v16 = vand.u32 127, %v221_v10  ;;  %s440_s22 = scalar_lea.hbm %s597_s1, 16 }
  0x15   :  { %38 = vxpose.xlu0.b32.start.end [1/1] (short) (narrow) %v32_v1, 40  ;;  %381 = vmatpush3.msra.mxu0 %v32_v1  ;;  %31 = vst.msk [vmem:[#allocation2 + $0x20] sm:$0x1] %vm30_vm3, %v455_v0  ;;  %p441_p8 = scmp.ne.s32.totalorder %s597_s1, %s440_s22  ;;  %p444_p9 = scmp.lt.u32.totalorder %s440_s22, %s597_s1 }
  0x16   :  { %398 = vmatpush3.msra.mxu1 %v32_v1  ;;  %406 = vset.pattern.permute.xlu1 %v457_v7  ;;  %vm240_vm4 = vcmp.eq.s32.totalorder %v492_v15, %v494_v16  ;;  %v500_v21 = vadd.s32 8, %v492_v15  ;;  %v513_v29 = vadd.s32 16, %v492_v15  ;;  %v526_v37 = vadd.s32 24, %v492_v15 }
  0x17   :  { %v223_v61 = vsub.s32 0, %v492_v15  ;;  %p446_p10 = pnand %p444_p9, %p441_p8 }
  0x18   :  { %vm241_vm6 = vcmp.eq.s32.totalorder %v500_v21, %v494_v16  ;;  %vm242_vm7 = vcmp.eq.s32.totalorder %v513_v29, %v494_v16  ;;  %vm243_vm8 = vcmp.eq.s32.totalorder %v526_v37, %v494_v16 }
  0x1a   :  { %v33_v8 = vld [vmem:[#allocation2] sm:$0xff]  ;;  %v34_v13 = vld [vmem:[#allocation2 + $0x8] sm:$0xff] }
  0x1b   :  { %v35_v19 = vld [vmem:[#allocation2 + $0x10] sm:$0xff]  ;;  %v36_v24 = vld [vmem:[#allocation2 + $0x18] sm:$0xff] }
  0x1c   :  { %v37_v33 = vld [vmem:[#allocation2 + $0x20] sm:$0x1] }
  0x3e   :  { %407 = vset.pattern.permute.xlu0 %v457_v7 }
  0x95   :  { %v54_v2 = vpop.trf.xlu0 }
  0x96   :  { %383 = vmatmul.mubr.msk.f32.vlgmr.msra.gmra.mrb[0].mxu0 %vm70_vm2, %v54_v2 }
  0x97   :  { %385 = vmatprep.mubr.msk.f32.mxu0 %vm456_vm0, %v455_v0 }
  0x99   :  { %v55_v3 = vpop.trf.xlu0 }
  0x9a   :  { %386 = vmatmul.mubr.msk.f32.gmra.mrb[2].mxu0 %vm70_vm2, %v55_v3 }
  0x9b   :  { %388 = vmatprep.mubr.msk.f32.mxu0 %vm456_vm0, %v455_v0 }
  0x9d   :  { %v56_v4 = vpop.trf.xlu0 }
  0x9e   :  { %389 = vmatmul.mubr.msk.f32.gmra.mrb[4].mxu0 %vm70_vm2, %v56_v4 }
  0xa1   :  { %v57_v5 = vpop.trf.xlu0 }
  0xa2   :  { %392 = vmatmul.mubr.msk.f32.vlgmr.msra.gmra.mrb[0].mxu1 %vm70_vm2, %v57_v5 }
  0xa3   :  { %394 = vmatprep.mubr.msk.f32.mxu1 %vm456_vm0, %v455_v0 }
  0xa5   :  { %v58_v6 = vpop.trf.xlu0 }
  0xa6   :  { %395 = vmatmul.mubr.msk.f32.gmra.mrb[2].mxu1 %vm70_vm2, %v58_v6 }
 0x169   :  { %v152_v9 = vpop.f32.mrb[0].mxu0 }
 0x16a   :  { %v176_v11 = vadd.f32 %v152_v9, %v33_v8  ;;  %v384_v12 = vpop.f32.mrb[1].mxu0 }
 0x16c   :  { %182 = vst.msk [vmem:[#allocation2] sm:$0xff] %vm25_vm1, %v176_v11 }
 0x16d   :  { %v157_v14 = vpop.f32.mrb[2].mxu0 }
 0x16e   :  { %v177_v17 = vadd.f32 %v157_v14, %v34_v13  ;;  %v387_v18 = vpop.f32.mrb[3].mxu0 }
 0x170   :  { %183 = vst.msk [vmem:[#allocation2 + $0x8] sm:$0xff] %vm25_vm1, %v177_v17 }
 0x171   :  { %v162_v20 = vpop.f32.mrb[4].mxu0 }
 0x172   :  { %v178_v22 = vadd.f32 %v162_v20, %v35_v19  ;;  %v390_v23 = vpop.f32.mrb[5].mxu0 }
 0x173   :  { %v502_v25 = vld [vmem:[#allocation2] sm:$0xff] }
 0x174   :  { %184 = vst.msk [vmem:[#allocation2 + $0x10] sm:$0xff] %vm25_vm1, %v178_v22  ;;  %v244_v26 = vsel %vm240_vm4, %v502_v25, 0.0  ;;  %v197_v0 = vmul.f32 0.125, %v502_v25 }
 0x175   :  { %v167_v27 = vpop.f32.mrb[0].mxu1  ;;  %v249_v28 = vsel %vm248_vm5, %v244_v26, 0.0 }
 0x176   :  { %v179_v30 = vadd.f32 %v167_v27, %v36_v24  ;;  %v393_v31 = vpop.f32.mrb[1].mxu1  ;;  %262 = vadd.xlane.f32.xlu0 %v249_v28  ;;  %v273_v1 = vmul.f32 %v197_v0, %v502_v25 }
 0x177   :  { %v515_v32 = vld [vmem:[#allocation2 + $0x8] sm:$0xff] }
 0x178   :  { %185 = vst.msk [vmem:[#allocation2 + $0x18] sm:$0xff] %vm25_vm1, %v179_v30  ;;  %v245_v34 = vsel %vm241_vm6, %v515_v32, 0.0  ;;  %v198_v2 = vmul.f32 0.125, %v515_v32 }
 0x179   :  { %v250_v35 = vsel %vm248_vm5, %v245_v34, 0.0  ;;  %v172_v36 = vpop.f32.mrb[2].mxu1 }
 0x17a   :  { %264 = vadd.xlane.f32.xlu1 %v250_v35  ;;  %v251_v38 = vadd.f32 %v250_v35, %v249_v28  ;;  %v180_v39 = vadd.f32 %v172_v36, %v37_v33  ;;  %v396_v40 = vpop.f32.mrb[3].mxu1  ;;  %v274_v6 = vmul.f32 %v198_v2, %v515_v32 }
 0x17b   :  { %v528_v41 = vld [vmem:[#allocation2 + $0x10] sm:$0xff] }
 0x17c   :  { %v246_v42 = vsel %vm242_vm7, %v528_v41, 0.0  ;;  %187 = vst.msk [vmem:[#allocation2 + $0x20] sm:$0x1] %vm30_vm3, %v180_v39  ;;  %v199_v7 = vmul.f32 0.125, %v528_v41 }
 0x17d   :  { %v252_v43 = vsel %vm248_vm5, %v246_v42, 0.0 }
 0x17e   :  { %266 = vadd.xlane.f32.xlu1 %v252_v43  ;;  %v253_v44 = vadd.f32 %v252_v43, %v251_v38  ;;  %v275_v12 = vmul.f32 %v199_v7, %v528_v41 }
 0x17f   :  { %v538_v45 = vld [vmem:[#allocation2 + $0x18] sm:$0xff] }
 0x180   :  { %v247_v46 = vsel %vm243_vm8, %v538_v45, 0.0  ;;  %v200_v13 = vmul.f32 0.125, %v538_v45 }
 0x181   :  { %v254_v47 = vsel %vm248_vm5, %v247_v46, 0.0 }
 0x182   :  { %268 = vadd.xlane.f32.xlu1 %v254_v47  ;;  %v255_v48 = vadd.f32 %v254_v47, %v253_v44  ;;  %v276_v20 = vmul.f32 %v200_v13, %v538_v45 }
 0x183   :  { %v195_v50 = vld [vmem:[#allocation2 + $0x20] sm:$0x1] }
 0x184   :  { %v256_v49 = vrot.slane %v255_v48, 4  ;;  %v196_v52 = vmul.f32 0.125, %v195_v50 }
 0x186   :  { %v257_v51 = vadd.f32 %v256_v49, %v255_v48  ;;  %v270_v55 = vmul.f32 %v196_v52, %v195_v50  ;;  %v224_v38 = vrot.slane %v196_v52, %v223_v61 }
 0x188   :  { %v258_v53 = vrot.slane %v257_v51, 2 }
 0x18a   :  { %v259_v54 = vadd.f32 %v258_v53, %v257_v51 }
 0x18c   :  { %v260_v56 = vrot.slane %v259_v54, 1 }
 0x18e   :  { %v261_v57 = vadd.f32 %v260_v56, %v259_v54 }
 0x190   :  { %v271_v58 = vsub.f32 %v261_v57, %v270_v55 }
 0x192   :  { %v272_v59 = vmul.f32 0.14285715, %v271_v58 }
 0x193   :  { %203 = vperm.xlu1 %406, %v502_v25  }
 0x194   :  { %v285_v60 = vadd.f32 1e-08, %v272_v59 }
 0x196   :  { %408 = vrsqrt.f32 %v285_v60 }
 0x197   :  { %208 = vperm.xlu1 %406, %v515_v32  }
 0x19b   :  { %213 = vperm.xlu1 %406, %v528_v41  }
 0x19f   :  { %218 = vperm.xlu1 %406, %v538_v45  }
 0x1a0   :  { %v409_v62 = vpop.eup %408 }
 0x1a1   :  { %v550_v63 = vrot.slane %v409_v62, %v223_v61 }
 0x203   :  { %v263_v3 = vpop.xlane.xlu0 %262 }
 0x204   :  { %v277_v4 = vsub.f32 %v263_v3, %v273_v1 }
 0x206   :  { %v281_v5 = vmul.f32 0.14285715, %v277_v4 }
 0x207   :  { %v265_v8 = vpop.xlane.xlu1 %264 }
 0x208   :  { %v287_v9 = vadd.f32 1e-08, %v281_v5  ;;  %v278_v10 = vsub.f32 %v265_v8, %v274_v6 }
 0x20a   :  { %410 = vrsqrt.f32 %v287_v9  ;;  %v282_v11 = vmul.f32 0.14285715, %v278_v10 }
 0x20b   :  { %v267_v14 = vpop.xlane.xlu1 %266 }
 0x20c   :  { %v288_v17 = vadd.f32 1e-08, %v282_v11  ;;  %v279_v18 = vsub.f32 %v267_v14, %v275_v12 }
 0x20e   :  { %412 = vrsqrt.f32 %v288_v17  ;;  %v283_v19 = vmul.f32 0.14285715, %v279_v18 }
 0x20f   :  { %v269_v22 = vpop.xlane.xlu1 %268 }
 0x210   :  { %v289_v23 = vadd.f32 1e-08, %v283_v19  ;;  %v280_v24 = vsub.f32 %v269_v22, %v276_v20 }
 0x212   :  { %414 = vrsqrt.f32 %v289_v23  ;;  %v284_v26 = vmul.f32 0.14285715, %v280_v24 }
 0x213   :  { %v204_v34 = vpop.permute.xlu1 %203 }
 0x214   :  { %v411_v27 = vpop.eup %410  ;;  %v290_v28 = vadd.f32 1e-08, %v284_v26  ;;  %v225_v39 = vmul.f32 %v224_v38, %v204_v34 }
 0x215   :  { %297 = vperm.xlu1 %406, %v411_v27  }
 0x216   :  { %416 = vrsqrt.f32 %v290_v28  ;;  %v229_v43 = vsub.f32 %v502_v25, %v225_v39 }
 0x217   :  { %v209_v35 = vpop.permute.xlu1 %208 }
 0x218   :  { %v413_v30 = vpop.eup %412  ;;  %v226_v42 = vmul.f32 %v224_v38, %v209_v35 }
 0x219   :  { %302 = vperm.xlu1 %406, %v413_v30  }
 0x21a   :  { %v230_v49 = vsub.f32 %v515_v32, %v226_v42 }
 0x21b   :  { %v214_v36 = vpop.permute.xlu1 %213 }
 0x21c   :  { %v415_v31 = vpop.eup %414  ;;  %v227_v47 = vmul.f32 %v224_v38, %v214_v36 }
 0x21d   :  { %307 = vperm.xlu1 %406, %v415_v31  }
 0x21e   :  { %v231_v55 = vsub.f32 %v528_v41, %v227_v47 }
 0x21f   :  { %v219_v40 = vpop.permute.xlu1 %218 }
 0x220   :  { %v417_v33 = vpop.eup %416  ;;  %v228_v54 = vmul.f32 %v224_v38, %v219_v40 }
 0x221   :  { %312 = vperm.xlu1 %406, %v417_v33  }
 0x222   :  { %v232_v60 = vsub.f32 %v538_v45, %v228_v54 }
 0x294   :  { %v298_v44 = vpop.permute.xlu1 %297 }
 0x295   :  { %v315_v46 = vmul.f32 %v298_v44, %v229_v43 }
 0x297   :  { %v323_v48 = vmul.f32 %v550_v63, %v315_v46 }
 0x298   :  { %v303_v50 = vpop.permute.xlu1 %302 }
 0x299   :  { %v327_v51 = vsel %vm240_vm4, 0.0, %v323_v48  ;;  %v316_v53 = vmul.f32 %v303_v50, %v230_v49 }
 0x29a   :  { %v331_v56 = vmul.f32 %v327_v51, %v327_v51 }
 0x29b   :  { %v324_v52 = vmul.f32 %v550_v63, %v316_v53 }
 0x29c   :  { %v308_v25 = vpop.permute.xlu1 %307  ;;  %v335_v61 = vsel %vm248_vm5, %v331_v56, 0.0 }
 0x29d   :  { %v328_v57 = vsel %vm241_vm6, 0.0, %v324_v52  ;;  %v317_v58 = vmul.f32 %v308_v25, %v231_v55 }
 0x29e   :  { %v332_v59 = vmul.f32 %v328_v57, %v328_v57 }
 0x29f   :  { %v325_v32 = vmul.f32 %v550_v63, %v317_v58 }
 0x2a0   :  { %v313_v15 = vpop.permute.xlu1 %312  ;;  %v336_v62 = vsel %vm248_vm5, %v332_v59, 0.0 }
 0x2a1   :  { %v329_v41 = vsel %vm242_vm7, 0.0, %v325_v32  ;;  %v318_v0 = vmul.f32 %v313_v15, %v232_v60  ;;  %v337_v1 = vadd.f32 %v336_v62, %v335_v61 }
 0x2a2   :  { %v333_v2 = vmul.f32 %v329_v41, %v329_v41 }
 0x2a3   :  { %v326_v21 = vmul.f32 %v550_v63, %v318_v0 }
 0x2a4   :  { %v338_v3 = vsel %vm248_vm5, %v333_v2, 0.0 }
 0x2a5   :  { %v330_v45 = vsel %vm243_vm8, 0.0, %v326_v21  ;;  %v339_v4 = vadd.f32 %v338_v3, %v337_v1 }
 0x2a6   :  { %v334_v5 = vmul.f32 %v330_v45, %v330_v45 }
 0x2a8   :  { %v340_v6 = vsel %vm248_vm5, %v334_v5, 0.0 }
 0x2a9   :  { %v341_v7 = vadd.f32 %v340_v6, %v339_v4 }
 0x2ab   :  { %342 = vadd.xlane.f32.xlu1 %v341_v7 }
 0x338   :  { %v343_v8 = vpop.xlane.xlu1 %342 }
 0x339   :  { %v344_v29 = vrot.slane %v343_v8, 4 }
 0x33b   :  { %v345_v9 = vadd.f32 %v344_v29, %v343_v8 }
 0x33d   :  { %v346_v10 = vrot.slane %v345_v9, 2 }
 0x33f   :  { %v347_v11 = vadd.f32 %v346_v10, %v345_v9 }
 0x341   :  { %v348_v12 = vrot.slane %v347_v11, 1 }
 0x343   :  { %v349_v13 = vadd.f32 %v348_v12, %v347_v11 }
 0x345   :  { %399 = vpush %v349_v13 }
 0x376   :  { %s400_s0 = spop %399 }
 0x377   :  { %s351_s18 = smul.f32 0.0010080645, %s400_s0 }
 0x379   :  { %s352_s19 = smul.f32 0.125, %s351_s18 }
 0x37b   :  { %354 = sst [smem:[#allocation6]] %s352_s19 }
 0x37c   :  { %449 = shalt.err (!%p446_p10)
}
 0x37d   :  { %s458_s27 = smov [#allocation6]  }
 0x37e   :  { %362 = dma.smem_to_hbm %s458_s27, 16, %s597_s1, [#allocation5]  }
 0x37f   :  { %452 = dma.done.wait [#allocation5], 16  }
 0x380   :  { %453 = vsyncadd [#allocation5], 4294967280 }
 0x381   :  { %366 = sfence }
 0x382   :  { %367 = vsyncpa [#allocation4], 1 }
 0x383   :  { %368 = vsyncpa [#allocation5], 1 }

</bundles_post_ra>
